<compile_context>
chip_gen: v5e
topology: v5e:2x2
jax: 0.10.0
libtpu: 0.0.40
codegen_flags: <defaults>
</compile_context>

<pallas_src>
from functools import partial

import jax
import jax.numpy as jnp
from jax.experimental import pallas as pl
from jax.experimental.pallas import tpu as pltpu

BN_EPS = 1e-5


def molecular_gcn_kernel(h0_hbm, adj_hbm, wcat_ref, vec_ref, o_ref,
                         adj_vmem, dma_sems):
    """One grid step == one GCN layer.  o_ref (the pipelined output block,
    constant index_map) carries the node activations across layers."""
    layer = pl.program_id(0)

    @pl.when(layer == 0)
    def _load_resident():
        # One-time DMAs: h0 straight into the output carrier block, adjacency
        # into a single-buffered VMEM scratch.  Both stay resident for all
        # layers (no per-step re-DMA, no double buffering).
        cp_h = pltpu.make_async_copy(h0_hbm, o_ref, dma_sems.at[0])
        cp_a = pltpu.make_async_copy(adj_hbm, adj_vmem, dma_sems.at[1])
        cp_h.start()
        cp_a.start()
        cp_h.wait()
        cp_a.wait()

    h3 = o_ref[...]                               # (B, N, F)
    b, n, feats = h3.shape
    h = h3.reshape(b * n, feats)                  # major-dim collapse: layout no-op

    # Fused per-node matmul for both branches: wcat = [Wg | Wr] -> (B*N, 2F).
    hw = jnp.dot(h, wcat_ref[...], preferred_element_type=jnp.float32)
    # Splits are exactly at the 128-lane tile boundary -> views, not copies.
    hg = hw[:, :feats]                            # h @ Wg
    hr = hw[:, feats:]                            # h @ Wr

    bg = vec_ref[0:1, :]                          # graph-conv bias      (1, F)
    br = vec_ref[1:2, :]                          # residual-linear bias (1, F)
    gamma = vec_ref[2:3, :]                       # BN weight            (1, F)
    beta = vec_ref[3:4, :]                        # BN bias              (1, F)

    # Graph aggregation: block-diagonal batched matmul.  adj holds exact 0/1
    # values so bf16 adj is lossless; hg is cast to bf16, accumulation in f32.
    hg3 = hg.reshape(b, n, feats).astype(adj_vmem.dtype)
    conv = jnp.einsum("bij,bjf->bif", adj_vmem[...], hg3,
                      preferred_element_type=jnp.float32).reshape(b * n, feats)
    conv = jnp.maximum(conv + bg, 0.0)            # GraphConv bias + relu
    res = jnp.maximum(hr + br, 0.0)               # residual Linear + relu
    hn = conv + res                               # dropout p=0 -> identity

    # BatchNorm1d (training-mode batch statistics over ALL nodes, padded nodes
    # included, matching PyTorch), folded into per-feature scale/shift.
    inv_n = 1.0 / (b * n)
    mean = jnp.sum(hn, axis=0, keepdims=True) * inv_n
    ex2 = jnp.sum(hn * hn, axis=0, keepdims=True) * inv_n
    var = jnp.maximum(ex2 - mean * mean, 0.0)     # clamp f32 cancellation
    scale = gamma * jax.lax.rsqrt(var + BN_EPS)
    shift = beta - mean * scale
    hn = hn * scale + shift

    o_ref[...] = hn.reshape(b, n, feats)          # carrier for the next layer
    # Final HBM writeback of o_ref happens once, after the last grid step.


@partial(jax.jit, static_argnames=("batch_size",))
def molecular_gcn(node_feats, adj_b, params, batch_size):
    """node_feats: (B*N, in_feats); adj_b: (B, N, N) per-graph dense adjacency
    (bf16, exact 0/1).  Returns (B, N, out_feats)."""
    n_total, _ = node_feats.shape
    feats = params["w0"].shape[1]
    n_layers = params["wcat"].shape[0]
    b = batch_size
    n = n_total // b
    adj_itemsize = jnp.dtype(adj_b.dtype).itemsize

    # init_transform outside the kernel: one tiny XLA matmul.  h0 doubles as
    # the aliased output HBM buffer and is DMA'd once into the carrier block.
    h0 = (node_feats @ params["w0"]).reshape(b, n, feats)

    # Advisory cost estimate for the XLA scheduler.
    flops = n_layers * (2 * b * n * feats * 2 * feats          # fused [Wg|Wr]
                        + 2 * b * n * n * feats                # aggregation
                        + 10 * b * n * feats)                  # elementwise/BN
    bytes_accessed = (2 * b * n * feats * 4                    # h0 in + out
                      + b * n * n * adj_itemsize               # adjacency
                      + n_layers * (feats * 2 * feats * 4 + 4 * feats * 4))
    cost = pl.CostEstimate(flops=int(flops), transcendentals=int(n_layers * feats),
                           bytes_accessed=int(bytes_accessed))

    # Explicit scoped-VMEM budget (v5e default is only 16 MiB): resident blocks
    # + streamed weights (double-buffered) + matmul temporaries, with headroom.
    resident = (b * n * feats * 4                              # o_ref carrier
                + b * n * n * adj_itemsize                     # adj scratch
                + 2 * (feats * 2 * feats * 4 + 4 * feats * 4)  # 2x-buffered weights
                + 4 * b * n * 2 * feats * 4)                   # hw/conv/res temps
    vmem_limit = int(min(100 * 1024 * 1024, max(32 * 1024 * 1024, 2 * resident)))

    out = pl.pallas_call(
        molecular_gcn_kernel,
        out_shape=jax.ShapeDtypeStruct((b, n, feats), jnp.float32),
        grid_spec=pltpu.PrefetchScalarGridSpec(
            num_scalar_prefetch=0,
            grid=(n_layers,),
            in_specs=[
                # resident operands: raw HBM refs, single manual DMA at layer 0
                pl.BlockSpec(memory_space=pl.ANY),                            # h0
                pl.BlockSpec(memory_space=pl.ANY),                            # adj (B,N,N)
                # per-layer packed weights stream one block per grid step
                pl.BlockSpec((None, feats, 2 * feats), lambda l: (l, 0, 0)),  # [Wg|Wr]
                pl.BlockSpec((None, 4, feats), lambda l: (l, 0, 0)),          # [bg,br,gamma,beta]
            ],
            out_specs=pl.BlockSpec((b, n, feats), lambda l: (0, 0, 0)),
            scratch_shapes=[
                pltpu.VMEM((b, n, n), adj_b.dtype),        # single-buffered adjacency
                pltpu.SemaphoreType.DMA((2,)),
            ],
        ),
        input_output_aliases={0: 0},       # h0's HBM buffer is reused as the output
        compiler_params=pltpu.CompilerParams(
            dimension_semantics=("arbitrary",),            # layers are sequential
            vmem_limit_bytes=vmem_limit,
        ),
        cost_estimate=cost,
    )(h0, adj_b, params["wcat"], params["vecs"])

    return out


def init_params(key, in_feats, dim_embedding, n_layers, padding=True):
    """Deterministic synthetic parameters, PyTorch Linear-style uniform init.
    Weights stored as (in, out) so the hot path is x @ W."""
    keys = jax.random.split(key, 1 + 6 * n_layers)

    bound0 = 1.0 / jnp.sqrt(in_feats)
    w0 = jax.random.uniform(keys[0], (in_feats, dim_embedding), jnp.float32,
                            -bound0, bound0)
    if padding:
        # PyTorch: init_transform.weight[-1].fill_(0) with weight (out, in)
        # == zero the last output-embedding column in (in, out) layout.
        w0 = w0.at[:, -1].set(0.0)

    bound = 1.0 / jnp.sqrt(dim_embedding)
    wcats, vecs = [], []
    k = 1
    for _ in range(n_layers):
        wg = jax.random.uniform(keys[k], (dim_embedding, dim_embedding),
                                jnp.float32, -bound, bound); k += 1
        wr = jax.random.uniform(keys[k], (dim_embedding, dim_embedding),
                                jnp.float32, -bound, bound); k += 1
        bg = jax.random.uniform(keys[k], (dim_embedding,), jnp.float32,
                                -bound, bound); k += 1
        br = jax.random.uniform(keys[k], (dim_embedding,), jnp.float32,
                                -bound, bound); k += 1
        gamma = 1.0 + 0.1 * jax.random.normal(keys[k], (dim_embedding,),
                                              jnp.float32); k += 1
        beta = 0.1 * jax.random.normal(keys[k], (dim_embedding,),
                                       jnp.float32); k += 1
        wcats.append(jnp.concatenate([wg, wr], axis=1))        # (F, 2F)
        vecs.append(jnp.stack([bg, br, gamma, beta], axis=0))  # (4, F)

    return dict(w0=w0, wcat=jnp.stack(wcats), vecs=jnp.stack(vecs))


def make_batched_adjacency(batch_size, n):
    """(B, N, N) dense per-graph adjacencies (deterministic rings with a
    per-graph shift).  0/1 values are exact in bf16."""
    idx = jnp.arange(n)
    mats = []
    for g in range(batch_size):
        a = jnp.zeros((n, n), jnp.float32)
        a = a.at[idx, (idx + 1 + g) % n].set(1.0)
        a = a.at[idx, (idx - 1 - g) % n].set(1.0)
        mats.append(a)
    return jnp.stack(mats).astype(jnp.bfloat16)


def reference(node_feats, adj_b, params, batch_size):
    """Pure-JAX f32 reference of the same forward pass (training-mode BN)."""
    feats = params["w0"].shape[1]
    n_layers = params["wcat"].shape[0]
    b, n, _ = adj_b.shape
    adj = adj_b.astype(jnp.float32)
    h = node_feats @ params["w0"]
    for l in range(n_layers):
        wg = params["wcat"][l, :, :feats]
        wr = params["wcat"][l, :, feats:]
        bg = params["vecs"][l, 0]
        br = params["vecs"][l, 1]
        gamma = params["vecs"][l, 2]
        beta = params["vecs"][l, 3]
        hg = (h @ wg).reshape(b, n, feats)
        conv = jnp.einsum("bij,bjf->bif", adj, hg).reshape(b * n, feats)
        conv = jnp.maximum(conv + bg, 0.0)
        res = jnp.maximum(h @ wr + br, 0.0)
        hn = conv + res
        m = jnp.mean(hn, axis=0, keepdims=True)
        v = jnp.mean((hn - m) ** 2, axis=0, keepdims=True)
        h = (hn - m) / jnp.sqrt(v + BN_EPS) * gamma + beta
    return h.reshape(b, n, feats)


if __name__ == "__main__":
    # Small config consistent with the module:
    #   batch_size=2 graphs, 16 (padded) nodes/graph, NODE_IN_FEATS=32,
    #   NODE_IN_EMBEDDING=128, HIDDEN_LAYERS=[128, 128]
    BATCH, N_NODES, IN_FEATS, DIM_EMB, N_LAYERS = 2, 16, 32, 128, 2

    key = jax.random.PRNGKey(0)
    kx, kp = jax.random.split(key)
    node_feats = jax.random.normal(kx, (BATCH * N_NODES, IN_FEATS), jnp.float32)
    adj_b = make_batched_adjacency(BATCH, N_NODES)
    params = init_params(kp, IN_FEATS, DIM_EMB, N_LAYERS, padding=True)

    out = molecular_gcn(node_feats, adj_b, params, batch_size=BATCH)
    out = jax.block_until_ready(out)

    ref = reference(node_feats, adj_b, params, BATCH)
    assert out.shape == (BATCH, N_NODES, DIM_EMB)
    # bf16 aggregation (with f32 accumulation) introduces ~1e-3-level error per
    # layer vs the pure-f32 reference; 2e-2 still cleanly separates a correct
    # kernel from a broken one.
    max_err = jnp.max(jnp.abs(out - ref))
    assert jnp.allclose(out, ref, atol=2e-2, rtol=2e-2), f"max abs err {max_err}"
    print("KERNEL_OK")
</pallas_src>

<mosaic_0001>
module attributes {stable_mosaic.version = 11 : i64} {
  func.func @molecular_gcn_kernel(%arg0: i32, %arg1: memref<2x16x128xf32, #tpu.memory_space<any>>, %arg2: memref<2x16x16xbf16, #tpu.memory_space<any>>, %arg3: memref<1x128x256xf32, #tpu.memory_space<vmem>>, %arg4: memref<1x4x128xf32, #tpu.memory_space<vmem>>, %arg5: memref<2x16x128xf32, #tpu.memory_space<vmem>>, %arg6: memref<2x16x16xbf16, #tpu.memory_space<vmem>>, %arg7: memref<2x!tpu.dma_semaphore, #tpu.memory_space<semaphore_mem>>) attributes {dimension_semantics = [#tpu.dimension_semantics<arbitrary>], iteration_bounds = array<i64: 2>, scalar_prefetch = 0 : i64, scratch_operands = 2 : i64, tpu.core_type = #tpu.core_type<tc>, window_params = [{}, {}, {transform_indices = @transform_2, window_bounds = array<i64: 1, 128, 256>}, {transform_indices = @transform_3, window_bounds = array<i64: 1, 4, 128>}, {pipeline_mode = #tpu.pipeline_mode<synchronous>, transform_indices = @transform_4, window_bounds = array<i64: 2, 16, 128>}]} {
    %c0_i32 = arith.constant 0 : i32
    %0 = arith.cmpi eq, %arg0, %c0_i32 : i32
    %1 = arith.extui %0 : i1 to i32
    %c0_i32_0 = arith.constant 0 : i32
    %2 = arith.cmpi ne, %1, %c0_i32_0 : i32
    scf.if %2 {
      %c0_i32_30 = arith.constant 0 : i32
      %57 = tpu.memref_slice %arg7[%c0_i32_30] : memref<2x!tpu.dma_semaphore, #tpu.memory_space<semaphore_mem>> -> memref<1x!tpu.dma_semaphore, #tpu.memory_space<semaphore_mem>>
      %58 = tpu.memref_squeeze %57 : memref<1x!tpu.dma_semaphore, #tpu.memory_space<semaphore_mem>> -> memref<!tpu.dma_semaphore, #tpu.memory_space<semaphore_mem>>
      tpu.enqueue_dma source(%arg1 : memref<2x16x128xf32, #tpu.memory_space<any>>) target(%arg5 : memref<2x16x128xf32, #tpu.memory_space<vmem>>) target_semaphore(%58 : memref<!tpu.dma_semaphore, #tpu.memory_space<semaphore_mem>>)
      %c1_i32 = arith.constant 1 : i32
      %59 = tpu.memref_slice %arg7[%c1_i32] : memref<2x!tpu.dma_semaphore, #tpu.memory_space<semaphore_mem>> -> memref<1x!tpu.dma_semaphore, #tpu.memory_space<semaphore_mem>>
      %60 = tpu.memref_squeeze %59 : memref<1x!tpu.dma_semaphore, #tpu.memory_space<semaphore_mem>> -> memref<!tpu.dma_semaphore, #tpu.memory_space<semaphore_mem>>
      tpu.enqueue_dma source(%arg2 : memref<2x16x16xbf16, #tpu.memory_space<any>>) target(%arg6 : memref<2x16x16xbf16, #tpu.memory_space<vmem>>) target_semaphore(%60 : memref<!tpu.dma_semaphore, #tpu.memory_space<semaphore_mem>>)
      %c0_i32_31 = arith.constant 0 : i32
      %61 = tpu.memref_slice %arg7[%c0_i32_31] : memref<2x!tpu.dma_semaphore, #tpu.memory_space<semaphore_mem>> -> memref<1x!tpu.dma_semaphore, #tpu.memory_space<semaphore_mem>>
      %62 = tpu.memref_squeeze %61 : memref<1x!tpu.dma_semaphore, #tpu.memory_space<semaphore_mem>> -> memref<!tpu.dma_semaphore, #tpu.memory_space<semaphore_mem>>
      tpu.wait_dma2 semaphore(%62 : memref<!tpu.dma_semaphore, #tpu.memory_space<semaphore_mem>>) src(%arg1 : memref<2x16x128xf32, #tpu.memory_space<any>>) dst(%arg5 : memref<2x16x128xf32, #tpu.memory_space<vmem>>)
      %c1_i32_32 = arith.constant 1 : i32
      %63 = tpu.memref_slice %arg7[%c1_i32_32] : memref<2x!tpu.dma_semaphore, #tpu.memory_space<semaphore_mem>> -> memref<1x!tpu.dma_semaphore, #tpu.memory_space<semaphore_mem>>
      %64 = tpu.memref_squeeze %63 : memref<1x!tpu.dma_semaphore, #tpu.memory_space<semaphore_mem>> -> memref<!tpu.dma_semaphore, #tpu.memory_space<semaphore_mem>>
      tpu.wait_dma2 semaphore(%64 : memref<!tpu.dma_semaphore, #tpu.memory_space<semaphore_mem>>) src(%arg2 : memref<2x16x16xbf16, #tpu.memory_space<any>>) dst(%arg6 : memref<2x16x16xbf16, #tpu.memory_space<vmem>>)
    } else {
    }
    %c0 = arith.constant 0 : index
    %c0_1 = arith.constant 0 : index
    %c0_2 = arith.constant 0 : index
    %3 = vector.load %arg5[%c0, %c0_1, %c0_2] : memref<2x16x128xf32, #tpu.memory_space<vmem>>, vector<2x16x128xf32>
    %4 = vector.shape_cast %3 : vector<2x16x128xf32> to vector<32x128xf32>
    %c0_3 = arith.constant 0 : index
    %c0_4 = arith.constant 0 : index
    %c0_5 = arith.constant 0 : index
    %5 = vector.load %arg3[%c0_3, %c0_4, %c0_5] : memref<1x128x256xf32, #tpu.memory_space<vmem>>, vector<1x128x256xf32>
    %6 = vector.shape_cast %5 : vector<1x128x256xf32> to vector<128x256xf32>
    %cst = arith.constant dense<0.000000e+00> : vector<32x256xf32>
    %7 = tpu.matmul %4, %6, %cst {dimension_numbers = #tpu.dot_dimension_numbers<[1], [0], [0], [1], [0, 0, 1, 1], [], []>} : vector<32x128xf32>, vector<128x256xf32>, vector<32x256xf32> -> vector<32x256xf32>
    %8 = vector.extract_strided_slice %7 {offsets = [0, 0], sizes = [32, 128], strides = [1, 1]} : vector<32x256xf32> to vector<32x128xf32>
    %9 = vector.extract_strided_slice %7 {offsets = [0, 128], sizes = [32, 128], strides = [1, 1]} : vector<32x256xf32> to vector<32x128xf32>
    %c0_6 = arith.constant 0 : index
    %c0_7 = arith.constant 0 : index
    %c0_8 = arith.constant 0 : index
    %10 = vector.load %arg4[%c0_6, %c0_7, %c0_8] : memref<1x4x128xf32, #tpu.memory_space<vmem>>, vector<1x1x128xf32>
    %11 = vector.shape_cast %10 : vector<1x1x128xf32> to vector<1x128xf32>
    %c0_9 = arith.constant 0 : index
    %c1 = arith.constant 1 : index
    %c0_10 = arith.constant 0 : index
    %12 = vector.load %arg4[%c0_9, %c1, %c0_10] : memref<1x4x128xf32, #tpu.memory_space<vmem>>, vector<1x1x128xf32>
    %13 = vector.shape_cast %12 : vector<1x1x128xf32> to vector<1x128xf32>
    %c0_11 = arith.constant 0 : index
    %c2 = arith.constant 2 : index
    %c0_12 = arith.constant 0 : index
    %14 = vector.load %arg4[%c0_11, %c2, %c0_12] : memref<1x4x128xf32, #tpu.memory_space<vmem>>, vector<1x1x128xf32>
    %15 = vector.shape_cast %14 : vector<1x1x128xf32> to vector<1x128xf32>
    %c0_13 = arith.constant 0 : index
    %c3 = arith.constant 3 : index
    %c0_14 = arith.constant 0 : index
    %16 = vector.load %arg4[%c0_13, %c3, %c0_14] : memref<1x4x128xf32, #tpu.memory_space<vmem>>, vector<1x1x128xf32>
    %17 = vector.shape_cast %16 : vector<1x1x128xf32> to vector<1x128xf32>
    %18 = vector.shape_cast %8 : vector<32x128xf32> to vector<2x16x128xf32>
    %19 = arith.truncf %18 : vector<2x16x128xf32> to vector<2x16x128xbf16>
    %c0_15 = arith.constant 0 : index
    %c0_16 = arith.constant 0 : index
    %c0_17 = arith.constant 0 : index
    %20 = vector.load %arg6[%c0_15, %c0_16, %c0_17] : memref<2x16x16xbf16, #tpu.memory_space<vmem>>, vector<2x16x16xbf16>
    "tpu.trace_start"() <{level = 10 : i32, message = "bij,bjf->bif"}> : () -> ()
    %cst_18 = arith.constant dense<0.000000e+00> : vector<2x16x128xf32>
    %21 = tpu.matmul %20, %19, %cst_18 {dimension_numbers = #tpu.dot_dimension_numbers<[2], [1], [1], [2], [0, 0, 0, 1, 1, 2], [0], [0]>} : vector<2x16x16xbf16>, vector<2x16x128xbf16>, vector<2x16x128xf32> -> vector<2x16x128xf32>
    "tpu.trace_stop"() : () -> ()
    %22 = vector.shape_cast %21 : vector<2x16x128xf32> to vector<32x128xf32>
    %23 = vector.broadcast %11 : vector<1x128xf32> to vector<32x128xf32>
    %24 = arith.addf %22, %23 : vector<32x128xf32>
    %cst_19 = arith.constant 0.000000e+00 : f32
    %25 = vector.broadcast %cst_19 : f32 to vector<32x128xf32>
    %26 = arith.maximumf %24, %25 : vector<32x128xf32>
    %27 = vector.broadcast %13 : vector<1x128xf32> to vector<32x128xf32>
    %28 = arith.addf %9, %27 : vector<32x128xf32>
    %cst_20 = arith.constant 0.000000e+00 : f32
    %29 = vector.broadcast %cst_20 : f32 to vector<32x128xf32>
    %30 = arith.maximumf %28, %29 : vector<32x128xf32>
    %31 = arith.addf %26, %30 : vector<32x128xf32>
    %cst_21 = arith.constant dense<0.000000e+00> : vector<128xf32>
    %32 = vector.multi_reduction <add>, %31, %cst_21 [0] : vector<32x128xf32> to vector<128xf32>
    %33 = vector.shape_cast %32 : vector<128xf32> to vector<1x128xf32>
    %cst_22 = arith.constant 3.125000e-02 : f32
    %34 = vector.broadcast %cst_22 : f32 to vector<1x128xf32>
    %35 = arith.mulf %33, %34 : vector<1x128xf32>
    %36 = arith.mulf %31, %31 : vector<32x128xf32>
    %cst_23 = arith.constant dense<0.000000e+00> : vector<128xf32>
    %37 = vector.multi_reduction <add>, %36, %cst_23 [0] : vector<32x128xf32> to vector<128xf32>
    %38 = vector.shape_cast %37 : vector<128xf32> to vector<1x128xf32>
    %cst_24 = arith.constant 3.125000e-02 : f32
    %39 = vector.broadcast %cst_24 : f32 to vector<1x128xf32>
    %40 = arith.mulf %38, %39 : vector<1x128xf32>
    %41 = arith.mulf %35, %35 : vector<1x128xf32>
    %42 = arith.subf %40, %41 : vector<1x128xf32>
    %cst_25 = arith.constant 0.000000e+00 : f32
    %43 = vector.broadcast %cst_25 : f32 to vector<1x128xf32>
    %44 = arith.maximumf %42, %43 : vector<1x128xf32>
    %cst_26 = arith.constant 9.99999974E-6 : f32
    %45 = vector.broadcast %cst_26 : f32 to vector<1x128xf32>
    %46 = arith.addf %44, %45 : vector<1x128xf32>
    %47 = math.rsqrt %46 : vector<1x128xf32>
    %48 = arith.mulf %15, %47 : vector<1x128xf32>
    %49 = arith.mulf %35, %48 : vector<1x128xf32>
    %50 = arith.subf %17, %49 : vector<1x128xf32>
    %51 = vector.broadcast %48 : vector<1x128xf32> to vector<32x128xf32>
    %52 = arith.mulf %31, %51 : vector<32x128xf32>
    %53 = vector.broadcast %50 : vector<1x128xf32> to vector<32x128xf32>
    %54 = arith.addf %52, %53 : vector<32x128xf32>
    %55 = vector.shape_cast %54 : vector<32x128xf32> to vector<2x16x128xf32>
    %c0_27 = arith.constant 0 : index
    %c0_28 = arith.constant 0 : index
    %c0_29 = arith.constant 0 : index
    %56 = vector.load %arg5[%c0_27, %c0_28, %c0_29] : memref<2x16x128xf32, #tpu.memory_space<vmem>>, vector<2x16x128xf32>
    tpu.vector_store %arg5[%c0_27, %c0_28, %c0_29], %55 {strides = array<i32>} : memref<2x16x128xf32, #tpu.memory_space<vmem>>, vector<2x16x128xf32>,
    return
  }
  func.func @transform_2(%arg0: i32) -> (i32, i32, i32) {
    %c0_i32 = arith.constant 0 : i32
    %c0_i32_0 = arith.constant 0 : i32
    %c0_i32_1 = arith.constant 0 : i32
    return %arg0, %c0_i32, %c0_i32_0 : i32, i32, i32
  }
  func.func @transform_3(%arg0: i32) -> (i32, i32, i32) {
    %c0_i32 = arith.constant 0 : i32
    %c0_i32_0 = arith.constant 0 : i32
    %c0_i32_1 = arith.constant 0 : i32
    return %arg0, %c0_i32, %c0_i32_0 : i32, i32, i32
  }
  func.func @transform_4(%arg0: i32) -> (i32, i32, i32) {
    %c0_i32 = arith.constant 0 : i32
    %c0_i32_0 = arith.constant 0 : i32
    %c0_i32_1 = arith.constant 0 : i32
    %c0_i32_2 = arith.constant 0 : i32
    return %c0_i32, %c0_i32_0, %c0_i32_1 : i32, i32, i32
  }
}

</mosaic_0001>

<bundles_post_ra>
// kernel: molecular_gcn.1
= control target key start
LH: loop header
LB: loop body
LE: loop exit
PB: predicated region body
PF: predicated region fallthrough
CT: control target
= control target key end

     0   :  { %9 = vsyncpa [#allocation5], 0  ;;  %s968_s0 = inlined_call_operand.hbm [shape: f32[2,16,128], index: 0, kind: input, shape index: {}, may-alias: {0,4}]   ;;  %s969_s1 = inlined_call_operand.vmem [shape: bf16[2,16,16], index: 1, kind: input, shape index: {}]   ;;  %s970_s2 = inlined_call_operand.hbm [shape: f32[2,128,256], index: 2, kind: input, shape index: {}]   ;;  %s971_s3 = inlined_call_operand.vmem [shape: f32[2,4,128], index: 3, kind: input, shape index: {}]   ;;  %s972_s4 = inlined_call_operand.hbm [shape: f32[2,16,128], index: 4, kind: output, shape index: {}, may-alias: {0,4}]  }
   0x1   :  { %11 = vsyncpa [#allocation5 + $0x1], 0 }
   0x2   :  { %12 = vsyncpa [#allocation6], 0  ;;  %s822_s15 = smov 0   ;;  %s824_s16 = smov 0  }
   0x3   :  { %s826_s17 = smov 0   ;;  %s828_s18 = smov 0  }
   0x4 LB: > { %s841_s19 = sadd.s32 4294967295, %s789_s18   ;;  %s844_s20 = sadd.s32 1, %s789_s18   ;;  %s789_s18 = sphi %s828_s18, %s979_s18   ;;  %s785_s17 = sphi %s826_s17, %s978_s17   ;;  %s781_s16 = sphi %s824_s16, %s977_s16   ;;  %s777_s15 = sphi %s822_s15, %s976_s15  }
   0x5   : > { %s22_s21 = ssub.s32 %s789_s18, %s844_s20  ;;  %s25_s22 = sadd.s32 1, %s785_s17 }
   0x6   : > { %p23_p0 = scmp.eq.s32.totalorder %s22_s21, 0  ;;  %p32_p1 = scmp.ne.s32.totalorder %s785_s17, %s781_s16 }
   0x7   : > { %p33_p2 = scmp.eq.s32.totalorder %s789_s18, 0  ;;  %p38_p3 = scmp.ne.s32.totalorder %s781_s16, %s777_s15 }
   0x8   : > { %s854_s23 = scalar_select %p23_p0, %s785_s17, %s25_s22  }
   0x9   : > { %p856_p4 = por %p33_p2, %p32_p1  ;;  %p39_p5 = scmp.eq.s32.totalorder %s841_s19, 0 }
   0xa   : > { %p620_p6 = scmp.lt.s32.totalorder %s789_s18, 2  ;;  %s109_s26 = sand.u32 1, %s785_s17  }
   0xb   : > { %p862_p7 = por %p39_p5, %p38_p3  ;;  %s552_s27 = sshll.u32 %s109_s26, 8 }
   0xc   : > { %s575_s28 = sshll.u32 %s789_s18, 8  ;;  %s113_s6 = scalar_lea.vmem [#allocation4], %s552_s27 }
   0xd   : > { %s118_s5 = scalar_lea.hbm %s970_s2, %s575_s28  ;;  %s121_s7 = sshll.u32 %s113_s6, 4  ;;  %s122_s7 = int_to_ptr.vmem [resolvable:$true] %s121_s7 }
   0xe   : > { %s119_s8 = sshll.u32 %s118_s5, 4  ;;  %p873_p8 = pnand %p620_p6, %p856_p4  ;;  %s120_s8 = int_to_ptr.hbm [resolvable:$true] %s119_s8 }
   0xf   : > { %p555_p9 = scmp.ge.s32.totalorder %s789_s18, 1  ;;  %s110_s10 = scalar_lea.sflag [#allocation5], %s109_s26 }
  0x10   : > { %s665_s11 = sshra.s32 %s120_s8, 4  ;;  %p669_p11 = pneg %p873_p8  ;;  %s666_s11 = int_to_ptr.hbm [resolvable:$true] %s665_s11 }
  0x11   : > { %s667_s12 = scalar_lea.hbm %s666_s11, 256  ;;  %s672_s15 = scalar_lea.hbm %s970_s2, 512 }
  0x12   : > { %p668_p10 = scmp.ne.s32.totalorder %s666_s11, %s667_s12  ;;  %p673_p0 = scmp.lt.s32.totalorder %s666_s11, %s970_s2 }
  0x13   : > { %p674_p1 = scmp.lt.s32.totalorder %s672_s15, %s667_s12 }
  0x14   : > { %p670_p12 = pnand %p669_p11, %p668_p10 }
  0x15   : > { %p675_p2 = por %p674_p1, %p673_p0 }
  0x16   : > { %p671_p13 = pneg %p670_p12 }
  0x18   : > { %p676_p3 = pnand %p675_p2, %p671_p13 }
  0x1a   : > { %679 = shalt.err (!%p676_p3)
}
  0x1b   : > { %s791_s24 = smov 256   ;;  %s792_s26 = smov 16  }
  0x1c   : > { %619 = dma.hbm_to_vmem [thread:$0]  (!%p873_p8), %s120_s8, 4096, %s122_s7, %s110_s10, %s791_s24, %s791_s24, %s792_s26  }
  0x1d   : > { %p136_p4 = scmp.lt.s32.totalorder %s789_s18, 3 }
  0x1f   : > { %p137_p5 = pnand %p555_p9, %p136_p4 }
  0x20   : > { %s142_s27 = sand.u32 (!%p137_p5), 1, %s781_s16  }
  0x21   : > { %140 = sbr.rel (%p137_p5) target bundleno = 443 (0x1bb), region = 28  ;;  %s556_s28 = sshll.u32 (!%p137_p5), %s142_s27, 8 }
  0x22   : > { %s143_s29 = scalar_lea.sflag (!%p137_p5), [#allocation5], %s142_s27  ;;  %s892_s30 = scalar_lea.vmem (!%p137_p5), [#allocation4], %s556_s28 }
  0x26   : > { %764 = dma.done.wait (%p862_p7), %s143_s29, 4096  }
  0x27   : > { %766 = vsyncadd (%p862_p7), %s143_s29, 4294963200  ;;  %p167_p6 = scmp.lt.s32.totalorder %s841_s19, 1  ;;  %p558_p8 = scmp.ne.s32.totalorder %s841_s19, 0 }
  0x28   : > { %s183_s11 = sshll.u32 (!%p558_p8), %s968_s0, 4  ;;  %s793_s15 = smov (!%p558_p8), [#allocation7]   ;;  %s184_s11 = int_to_ptr.hbm [resolvable:$true] %s183_s11 }
  0x29   : > { %s168_s5 = scalar_select %p167_p6, %s841_s19, 1 }
  0x2a   : > { %175 = sbr.rel (%p558_p8) target bundleno = 55 (0x37), region = 36  ;;  %s185_s21 = sshll.u32 (!%p558_p8), %s793_s15, 4  ;;  %s186_s21 = int_to_ptr.vmem [resolvable:$true] %s185_s21 }
  0x2b   : > { %s557_s6 = sshll.u32 %s168_s5, 2 }
  0x2c   : > { %s903_s8 = scalar_lea.vmem %s971_s3, %s557_s6 }
  0x2d   : > { %188 = dma.hbm_to_vmem [thread:$0]  (!%p558_p8), %s184_s11, 512, %s186_s21, [#allocation3] }
  0x2f   : > { %v200_v0 = vld [vmem:[%s969_s1] sm:$0xff]  ;;  %v202_v1 = vld [vmem:[%s969_s1 + $0x8] sm:$0xff] }
  0x30   : > { %201 = vst [vmem:[#allocation2] sm:$0xff] %v200_v0 }
  0x31   : > { %203 = vst [vmem:[#allocation2 + $0x8] sm:$0xff] %v202_v1 }
  0x32   : > { %209 = vsyncadd [#allocation3 + $0x1], 256 }
  0x33   : > { %767 = dma.done.wait [#allocation3], 512 }
  0x34   : > { %768 = vsyncadd [#allocation3], 4294966784 }
  0x35   : > { %769 = dma.done.wait [#allocation3 + $0x1], 256 }
  0x36   : > { %770 = vsyncadd [#allocation3 + $0x1], 4294967040 }
  0x37 PF: > { %v253_v2 = vld [vmem:[%s892_s30 + $0xf0] sm:$0xff]  ;;  %v251_v3 = vld [vmem:[%s892_s30 + $0xe0] sm:$0xff]  ;;  %v254_v12 = vld [vmem:[%s892_s30 + $0xf8] sm:$0xff]  ;;  %vm336_vm0 = vcmask 130048   ;;  %s794_s22 = smov [#allocation7]   ;;  %s466_s28 = sshll.u32 %s972_s4, 4  ;;  %s467_s28 = int_to_ptr.hbm [resolvable:$true] %s466_s28 }
  0x38   : > { %255 = vmatpush.msra.mxu0 %v253_v2  ;;  %578 = vmatpush.msra.mxu2 %v253_v2  ;;  %v249_v4 = vld [vmem:[%s892_s30 + $0xd0] sm:$0xff]  ;;  %v247_v5 = vld [vmem:[%s892_s30 + $0xc0] sm:$0xff]  ;;  %v252_v13 = vld [vmem:[%s892_s30 + $0xe8] sm:$0xff]  ;;  %s464_s24 = sshll.u32 %s794_s22, 4  ;;  %p621_p7 = scmp.eq.s32.totalorder %s841_s19, 1  ;;  %s465_s24 = int_to_ptr.vmem [resolvable:$true] %s464_s24 }
  0x39   : > { %v245_v6 = vld [vmem:[%s892_s30 + $0xb0] sm:$0xff]  ;;  %v243_v7 = vld [vmem:[%s892_s30 + $0xa0] sm:$0xff]  ;;  %284 = vmatpush.msra.mxu1 %v254_v12  ;;  %594 = vmatpush.msra.mxu3 %v254_v12  ;;  %v250_v15 = vld [vmem:[%s892_s30 + $0xd8] sm:$0xff]  ;;  %s795_s29 = smov 128  }
  0x3a   : > { %256 = vmatpush.msra.mxu0 %v251_v3  ;;  %579 = vmatpush.msra.mxu2 %v251_v3  ;;  %v241_v8 = vld [vmem:[%s892_s30 + $0x90] sm:$0xff]  ;;  %v239_v9 = vld [vmem:[%s892_s30 + $0x80] sm:$0xff]  ;;  %v248_v17 = vld [vmem:[%s892_s30 + $0xc8] sm:$0xff] }
  0x3b   : > { %v237_v10 = vld [vmem:[%s892_s30 + $0x70] sm:$0xff]  ;;  %v235_v11 = vld [vmem:[%s892_s30 + $0x60] sm:$0xff]  ;;  %285 = vmatpush.msra.mxu1 %v252_v13  ;;  %595 = vmatpush.msra.mxu3 %v252_v13  ;;  %v246_v19 = vld [vmem:[%s892_s30 + $0xb8] sm:$0xff] }
  0x3c   : > { %257 = vmatpush.msra.mxu0 %v249_v4  ;;  %580 = vmatpush.msra.mxu2 %v249_v4  ;;  %v233_v14 = vld [vmem:[%s892_s30 + $0x50] sm:$0xff]  ;;  %v231_v16 = vld [vmem:[%s892_s30 + $0x40] sm:$0xff]  ;;  %v244_v21 = vld [vmem:[%s892_s30 + $0xa8] sm:$0xff] }
  0x3d   : > { %v229_v18 = vld [vmem:[%s892_s30 + $0x30] sm:$0xff]  ;;  %286 = vmatpush.msra.mxu1 %v250_v15  ;;  %596 = vmatpush.msra.mxu3 %v250_v15  ;;  %v227_v20 = vld [vmem:[%s892_s30 + $0x20] sm:$0xff]  ;;  %v242_v23 = vld [vmem:[%s892_s30 + $0x98] sm:$0xff] }
  0x3e   : > { %258 = vmatpush.msra.mxu0 %v247_v5  ;;  %581 = vmatpush.msra.mxu2 %v247_v5  ;;  %v225_v22 = vld [vmem:[%s892_s30 + $0x10] sm:$0xff]  ;;  %v223_v24 = vld [vmem:[%s892_s30] sm:$0xff]  ;;  %v222_v26 = vld [vmem:[#allocation7 + $0x18] sm:$0xff] }
  0x3f   : > { %287 = vmatpush.msra.mxu1 %v248_v17  ;;  %597 = vmatpush.msra.mxu3 %v248_v17  ;;  %v219_v25 = vld [vmem:[#allocation7] sm:$0xff]  ;;  %v220_v27 = vld [vmem:[#allocation7 + $0x8] sm:$0xff]  ;;  %v221_v28 = vld [vmem:[#allocation7 + $0x10] sm:$0xff] }
  0x40   : > { %259 = vmatpush.msra.mxu0 %v245_v6  ;;  %582 = vmatpush.msra.mxu2 %v245_v6  ;;  %v240_v29 = vld [vmem:[%s892_s30 + $0x88] sm:$0xff]  ;;  %v238_v30 = vld [vmem:[%s892_s30 + $0x78] sm:$0xff]  ;;  %v576_v47 = vld [vmem:[#allocation2] sm:$0xff] }
  0x41   : > { %288 = vmatpush.msra.mxu1 %v246_v19  ;;  %598 = vmatpush.msra.mxu3 %v246_v19  ;;  %v236_v31 = vld [vmem:[%s892_s30 + $0x68] sm:$0xff]  ;;  %v234_v32 = vld [vmem:[%s892_s30 + $0x58] sm:$0xff]  ;;  %v662_v58 = vld [vmem:[%s903_s8] ss:$0 sm:$0xff] }
  0x42   : > { %260 = vmatpush.msra.mxu0 %v243_v7  ;;  %583 = vmatpush.msra.mxu2 %v243_v7  ;;  %v232_v33 = vld [vmem:[%s892_s30 + $0x48] sm:$0xff]  ;;  %v230_v34 = vld [vmem:[%s892_s30 + $0x38] sm:$0xff]  ;;  %v661_v59 = vld [vmem:[%s903_s8 + $0x1] ss:$0 sm:$0xff] }
  0x43   : > { %289 = vmatpush.msra.mxu1 %v244_v21  ;;  %599 = vmatpush.msra.mxu3 %v244_v21  ;;  %v228_v35 = vld [vmem:[%s892_s30 + $0x28] sm:$0xff]  ;;  %v226_v36 = vld [vmem:[%s892_s30 + $0x18] sm:$0xff] }
  0x44   : > { %261 = vmatpush.msra.mxu0 %v241_v8  ;;  %584 = vmatpush.msra.mxu2 %v241_v8  ;;  %v224_v37 = vld [vmem:[%s892_s30 + $0x8] sm:$0xff]  ;;  %v577_v53 = vld [vmem:[#allocation2 + $0x8] sm:$0xff]  ;;  %s796_s30 = smov 8  }
  0x45   : > { %290 = vmatpush.msra.mxu1 %v242_v23  ;;  %600 = vmatpush.msra.mxu3 %v242_v23 }
  0x46   : > { %262 = vmatpush.msra.mxu0 %v239_v9  ;;  %585 = vmatpush.msra.mxu2 %v239_v9 }
  0x47   : > { %291 = vmatpush.msra.mxu1 %v240_v29  ;;  %601 = vmatpush.msra.mxu3 %v240_v29 }
  0x48   : > { %263 = vmatpush.msra.mxu0 %v237_v10  ;;  %586 = vmatpush.msra.mxu2 %v237_v10 }
  0x49   : > { %292 = vmatpush.msra.mxu1 %v238_v30  ;;  %602 = vmatpush.msra.mxu3 %v238_v30 }
  0x4a   : > { %264 = vmatpush.msra.mxu0 %v235_v11  ;;  %587 = vmatpush.msra.mxu2 %v235_v11 }
  0x4b   : > { %293 = vmatpush.msra.mxu1 %v236_v31  ;;  %603 = vmatpush.msra.mxu3 %v236_v31 }
  0x4c   : > { %265 = vmatpush.msra.mxu0 %v233_v14  ;;  %588 = vmatpush.msra.mxu2 %v233_v14 }
  0x4d   : > { %294 = vmatpush.msra.mxu1 %v234_v32  ;;  %604 = vmatpush.msra.mxu3 %v234_v32 }
  0x4e   : > { %266 = vmatpush.msra.mxu0 %v231_v16  ;;  %589 = vmatpush.msra.mxu2 %v231_v16 }
  0x4f   : > { %295 = vmatpush.msra.mxu1 %v232_v33  ;;  %605 = vmatpush.msra.mxu3 %v232_v33 }
  0x50   : > { %267 = vmatpush.msra.mxu0 %v229_v18  ;;  %590 = vmatpush.msra.mxu2 %v229_v18 }
  0x51   : > { %296 = vmatpush.msra.mxu1 %v230_v34  ;;  %606 = vmatpush.msra.mxu3 %v230_v34 }
  0x52   : > { %268 = vmatpush.msra.mxu0 %v227_v20  ;;  %591 = vmatpush.msra.mxu2 %v227_v20 }
  0x53   : > { %297 = vmatpush.msra.mxu1 %v228_v35  ;;  %607 = vmatpush.msra.mxu3 %v228_v35 }
  0x54   : > { %269 = vmatpush.msra.mxu0 %v225_v22  ;;  %592 = vmatpush.msra.mxu2 %v225_v22 }
  0x55   : > { %298 = vmatpush.msra.mxu1 %v226_v36  ;;  %608 = vmatpush.msra.mxu3 %v226_v36 }
  0x56   : > { %270 = vmatpush.msra.mxu0 %v223_v24  ;;  %593 = vmatpush.msra.mxu2 %v223_v24 }
  0x57   : > { %271 = vmatmul.f32.vlgmr.msra.gmra.mxu0 %v219_v25  ;;  %280 = vmatmul.f32.vlgmr.msra.gmra.mxu2 %v222_v26 }
  0x58   : > { %299 = vmatpush.msra.mxu1 %v224_v37  ;;  %609 = vmatpush.msra.mxu3 %v224_v37 }
  0x59   : > { %300 = vmatmul.f32.vlgmr.msra.gmra.mxu1 %v219_v25  ;;  %309 = vmatmul.f32.vlgmr.msra.gmra.mxu3 %v222_v26 }
  0x5f   : > { %274 = vmatmul.f32.gmra.mxu0 %v220_v27 }
  0x61   : > { %303 = vmatmul.f32.gmra.mxu1 %v220_v27 }
  0x67   : > { %277 = vmatmul.f32.gmra.mxu0 %v221_v28 }
  0x69   : > { %306 = vmatmul.f32.gmra.mxu1 %v221_v28 }
  0xd4   : > { %v272_v38 = vpop.f32.mrf.mxu0 }
  0xd5   : > { %v317_v39 = vpack.c.bf16 %v272_v38, %v272_v38 }
  0xd6   : > { %v301_v54 = vpop.f32.mrf.mxu1 }
  0xd7   : > { %v332_v43 = vunpack.c.l.b16 %v317_v39  ;;  %v392_v62 = vadd.f32 %v661_v59, %v301_v54 }
  0xd9   : > { %v396_v6 = vmax.f32 %v392_v62, 0.0 }
  0xda   : > { %v281_v42 = vpop.f32.mrf.mxu2 }
  0xdb   : > { %v320_v46 = vpack.c.bf16 %v281_v42, %v281_v42 }
  0xdc   : > { %v275_v40 = vpop.f32.mrf.mxu0  ;;  %v310_v56 = vpop.f32.mrf.mxu3 }
  0xdd   : > { %v318_v41 = vpack.c.bf16 %v275_v40, %v275_v40  ;;  %v362_v50 = vunpack.c.l.b16 %v320_v46  ;;  %v395_v13 = vadd.f32 %v661_v59, %v310_v56 }
  0xde   : > { %v304_v55 = vpop.f32.mrf.mxu1 }
  0xdf   : > { %v333_v44 = vunpack.c.l.b16 %v318_v41  ;;  %v393_v63 = vadd.f32 %v661_v59, %v304_v55  ;;  %v399_v20 = vmax.f32 %v395_v13, 0.0 }
  0xe1   : > { %v334_v45 = vpack.c.b16 %v333_v44, %v332_v43  ;;  %v397_v7 = vmax.f32 %v393_v63, 0.0 }
  0xe3   : > { %347 = vmatpush.bf16.msrb.mxu2 %v334_v45 }
  0xe4   : > { %v278_v48 = vpop.f32.mrf.mxu0 }
  0xe5   : > { %v319_v49 = vpack.c.bf16 %v278_v48, %v278_v48 }
  0xe6   : > { %563 = vmatmul.msk.bf16.vlgmr.msrb.gmra.mxu2 %vm336_vm0, %v576_v47  ;;  %v307_v61 = vpop.f32.mrf.mxu1 }
  0xe7   : > { %v361_v51 = vunpack.c.l.b16 %v319_v49  ;;  %v394_v5 = vadd.f32 %v661_v59, %v307_v61 }
  0xe9   : > { %v363_v52 = vpack.c.b16 %v362_v50, %v361_v51  ;;  %v398_v12 = vmax.f32 %v394_v5, 0.0 }
  0xeb   : > { %375 = vmatpush.bf16.msrb.mxu3 %v363_v52 }
  0xee   : > { %568 = vmatmul.msk.bf16.vlgmr.msrb.gmra.mxu3 %vm336_vm0, %v577_v53  ;;  %v315_v53 = vld [vmem:[%s903_s8 + $0x2] sm:$0x1] }
 0x169   : > { %v349_v57 = vpop.f32.mrf.mxu2 }
 0x16a   : > { %v383_v60 = vadd.f32 %v662_v58, %v349_v57  ;;  %v316_v57 = vld [vmem:[%s903_s8 + $0x3] sm:$0x1] }
 0x16c   : > { %v387_v2 = vmax.f32 %v383_v60, 0.0 }
 0x16e   : > { %v400_v9 = vadd.f32 %v396_v6, %v387_v2 }
 0x170   : > { %v414_v16 = vmul.f32 %v400_v9, %v400_v9 }
 0x171   : > { %v351_v0 = vpop.f32.mrf.mxu2  ;;  %v377_v1 = vpop.f32.mrf.mxu3 }
 0x172   : > { %v384_v3 = vadd.f32 %v662_v58, %v351_v0  ;;  %v385_v4 = vadd.f32 %v662_v58, %v377_v1 }
 0x174   : > { %v388_v8 = vmax.f32 %v384_v3, 0.0  ;;  %v389_v11 = vmax.f32 %v385_v4, 0.0 }
 0x176   : > { %v401_v10 = vadd.f32 %v397_v7, %v388_v8  ;;  %v402_v18 = vadd.f32 %v398_v12, %v389_v11 }
 0x178   : > { %v415_v14 = vmul.f32 %v401_v10, %v401_v10  ;;  %v404_v17 = vadd.f32 %v401_v10, %v400_v9  ;;  %v416_v24 = vmul.f32 %v402_v18, %v402_v18 }
 0x179   : > { %v379_v15 = vpop.f32.mrf.mxu3 }
 0x17a   : > { %v386_v19 = vadd.f32 %v662_v58, %v379_v15  ;;  %v418_v21 = vadd.f32 %v415_v14, %v414_v16  ;;  %v405_v23 = vadd.f32 %v404_v17, %v402_v18 }
 0x17c   : > { %v390_v22 = vmax.f32 %v386_v19, 0.0  ;;  %v419_v26 = vadd.f32 %v418_v21, %v416_v24 }
 0x17e   : > { %v403_v25 = vadd.f32 %v399_v20, %v390_v22 }
 0x180   : > { %v406_v27 = vadd.f32 %v405_v23, %v403_v25  ;;  %v417_v28 = vmul.f32 %v403_v25, %v403_v25 }
 0x182   : > { %v407_v29 = vrot.slane %v406_v27, 4  ;;  %v420_v30 = vadd.f32 %v419_v26, %v417_v28 }
 0x184   : > { %v408_v31 = vadd.f32 %v407_v29, %v406_v27  ;;  %v421_v32 = vrot.slane %v420_v30, 4 }
 0x186   : > { %v409_v33 = vrot.slane %v408_v31, 2  ;;  %v422_v34 = vadd.f32 %v421_v32, %v420_v30 }
 0x188   : > { %v410_v35 = vadd.f32 %v409_v33, %v408_v31  ;;  %v423_v36 = vrot.slane %v422_v34, 2 }
 0x18a   : > { %v411_v37 = vrot.slane %v410_v35, 1  ;;  %v424_v38 = vadd.f32 %v423_v36, %v422_v34 }
 0x18c   : > { %v412_v39 = vadd.f32 %v411_v37, %v410_v35  ;;  %v425_v40 = vrot.slane %v424_v38, 1 }
 0x18e   : > { %v413_v41 = vmul.f32 0.03125, %v412_v39  ;;  %v426_v42 = vadd.f32 %v425_v40, %v424_v38 }
 0x190   : > { %v427_v43 = vmul.f32 0.03125, %v426_v42  ;;  %v428_v44 = vmul.f32 %v413_v41, %v413_v41 }
 0x192   : > { %v429_v45 = vsub.f32 %v427_v43, %v428_v44 }
 0x194   : > { %v430_v46 = vmax.f32 %v429_v45, 0.0 }
 0x196   : > { %v431_v47 = vadd.f32 1e-05, %v430_v46 }
 0x198   : > { %663 = vrsqrt.f32 %v431_v47  ;;  %vm438_vm2 = vweird.f32 %v431_v47 }
 0x19e   : > { %v664_v48 = vpop.eup %663 }
 0x19f   : > { %v433_v49 = vmul.f32 %v664_v48, %v431_v47  ;;  %vm439_vm1 = vweird.f32 %v664_v48 }
 0x1a0   : > { %vm440_vm3 = vmor %vm438_vm2, %vm439_vm1 }
 0x1a1   : > { %v434_v50 = vmul.f32 %v664_v48, %v433_v49 }
 0x1a3   : > { %v435_v51 = vmul.f32 0.5, %v434_v50 }
 0x1a5   : > { %v436_v52 = vsub.f32 1.5, %v435_v51 }
 0x1a7   : > { %v437_v54 = vmul.f32 %v664_v48, %v436_v52 }
 0x1a9   : > { %v441_v55 = vsel %vm440_vm3, %v664_v48, %v437_v54 }
 0x1aa   : > { %v442_v56 = vmul.f32 %v441_v55, %v315_v53 }
 0x1ac   : > { %v443_v58 = vmul.f32 %v442_v56, %v413_v41  ;;  %v445_v59 = vperm.slane %v442_v56, 0 }
 0x1ae   : > { %v444_v60 = vsub.f32 %v316_v57, %v443_v58  ;;  %v446_v61 = vmul.f32 %v445_v59, %v400_v9  ;;  %v447_v62 = vmul.f32 %v445_v59, %v401_v10  ;;  %v449_v63 = vmul.f32 %v445_v59, %v403_v25 }
 0x1af   : > { %v448_v1 = vmul.f32 %v445_v59, %v402_v18 }
 0x1b0   : > { %v450_v0 = vperm.slane %v444_v60, 0 }
 0x1b2   : > { %v454_v2 = vadd.f32 %v450_v0, %v449_v63  ;;  %v451_v3 = vadd.f32 %v450_v0, %v446_v61  ;;  %v452_v4 = vadd.f32 %v450_v0, %v447_v62  ;;  %v453_v5 = vadd.f32 %v450_v0, %v448_v1 }
 0x1b4   : > { %458 = vst [vmem:[#allocation7 + $0x18] sm:$0xff] %v454_v2 }
 0x1b5   : > { %455 = vst [vmem:[#allocation7] sm:$0xff] %v451_v3 }
 0x1b6   : > { %456 = vst [vmem:[#allocation7 + $0x8] sm:$0xff] %v452_v4 }
 0x1b7   : > { %457 = vst [vmem:[#allocation7 + $0x10] sm:$0xff] %v453_v5 }
 0x1b8   : > { %613 = dma.vmem_to_hbm [thread:$0]  (%p621_p7), %s465_s24, 512, %s467_s28, [#allocation6], %s795_s29, %s795_s29, %s796_s30  }
 0x1b9   : > { %772 = dma.done.wait (%p621_p7), [#allocation6], 512  }
 0x1ba   : > { %774 = vsyncadd (%p621_p7), [#allocation6], 4294966784 }
 0x1bb PF: > { %p15_p9 = scmp.ge.s32.totalorder %s844_s20, 4   ;;  %s976_s15 = smov %s781_s16 }
 0x1bc   : > { %s977_s16 = smov %s785_s17  ;;  %s978_s17 = smov %s854_s23 }
 0x1bd   : > { %s979_s18 = smov %s844_s20  ;;  %17 = sbr.rel (!%p15_p9) target bundleno = 4 (0x4), region = 101 }
 0x1c2   :  { %483 = vsyncpa [#allocation5], 1 }
 0x1c3   :  { %485 = vsyncpa [#allocation5 + $0x1], 1 }
 0x1c4   :  { %486 = vsyncpa [#allocation6], 1 }
 0x1c5   :  { %488 = vsyncpa [#allocation6 + $0x1], 1 }
 0x1c6   :  { %489 = vsyncmov [#allocation3] }
 0x1c9   :  { %s490_s19 = vpop.sfrf %489 }
 0x1ca   :  { %p573_p10 = scmp.ne.s32.totalorder %s490_s19, 0 }
 0x1cc   :  { %494 = shalt.err (%p573_p10)  }
 0x1cd   :  { %496 = vsyncmov [#allocation3 + $0x1] }
 0x1d0   :  { %s497_s5 = vpop.sfrf %496 }
 0x1d1   :  { %p574_p11 = scmp.ne.s32.totalorder %s497_s5, 0 }
 0x1d3   :  { %501 = shalt.err (%p574_p11)  }

</bundles_post_ra>
